<compile_context>
chip_gen: v6e
topology: v6e:2x2x1
jax: 0.10.0
libtpu: 0.0.40
codegen_flags: <defaults>
</compile_context>

<pallas_src>
import functools

import numpy as np
import jax
import jax.numpy as jnp
from jax.experimental import pallas as pl
from jax.experimental.pallas import tpu as pltpu


_FLAG_INIT = 1   # first step of a p-group: zero the accumulator
_FLAG_ACC = 2    # this step contributes a (x_tile @ one-hot) product
_FLAG_FINAL = 4  # last step of a p-group: cast/store (non-f32 outputs)


# ----------------------------- glue / setup ---------------------------------

def _tuple(val, n):
    if isinstance(val, (tuple, list)):
        assert len(val) == n
        return tuple(int(v) for v in val)
    return (int(val),) * n


def _check_output_size(output_size_numel):
    # The torch reference limits P to 2**24 because it round-trips indices through
    # float32.  We keep indices in int32 end-to-end, so only int32 range matters.
    if output_size_numel >= 2 ** 31:
        raise RuntimeError(
            "Output size elements(%d) must fit in int32" % output_size_numel
        )


def _build_fold_indices(output_size, kernel_size, dilation, padding, stride):
    """Static index map equivalent to torch's `unfoldNd(arange(numel))`.

    Returns int32 array of length prod(kernel_size) * prod(L): for column j of the
    (C, K*L)-reshaped input, idx[j] is the flat output position it is scattered
    into.  Zero-padded positions map to 0, matching the PyTorch reference quirk.
    """
    N = len(output_size)
    Ls = [
        (output_size[i] + 2 * padding[i] - dilation[i] * (kernel_size[i] - 1) - 1)
        // stride[i] + 1
        for i in range(N)
    ]
    K = int(np.prod(kernel_size))
    L = int(np.prod(Ls))

    k_grids = np.meshgrid(*[np.arange(k) for k in kernel_size], indexing="ij")
    l_grids = np.meshgrid(*[np.arange(l) for l in Ls], indexing="ij")
    kf = [g.reshape(K) for g in k_grids]
    lf = [g.reshape(L) for g in l_grids]

    out_strides = [int(np.prod(output_size[i + 1:])) for i in range(N)]

    idx = np.zeros((K, L), dtype=np.int64)
    valid = np.ones((K, L), dtype=bool)
    for i in range(N):
        s = lf[i][None, :] * stride[i] + kf[i][:, None] * dilation[i] - padding[i]
        valid &= (s >= 0) & (s < output_size[i])
        idx += np.where(valid, s, 0) * out_strides[i]
    idx = np.where(valid, idx, 0)  # padded entries alias output index 0 (torch quirk)
    return idx.reshape(-1).astype(np.int32)


# ----------------------------- tile selection --------------------------------

def _device_kind():
    try:
        return jax.devices()[0].device_kind.lower()
    except Exception:
        return ""


def _choose_tp(P, kind):
    # Output (MXU N) tile.  Native MXU width is 256 on v6e/v7x and 128 on v5e;
    # prefer divisors of P so no padded output slab has to be sliced afterwards.
    # v6e has the highest FLOP:BW ratio of the three, so bias it toward 512 to
    # raise the arithmetic intensity of each x re-fetch.
    cands = (512, 256, 128) if "v6" in kind else (256, 128)
    for t in cands:
        if P % t == 0:
            return t
    return 256  # fallback: pad P up; the wrapper slices the tail off


def _choose_tj(J, kind):
    # j-tile (MXU K dimension).  256 matches the v6e/v7x MXU tile; 128-256 is fine
    # on v5e.  Prefer divisors of J so the in-kernel ragged-tail mask compiles out.
    del kind
    for t in (256, 128):
        if J % t == 0:
            return t
    return 256  # fallback: ragged tail masked in-kernel (no HBM pad of x)


def _choose_tbc(BC, cap, itemsize):
    # batch*channel tile = MXU M dimension.  The per-step (tj, tp) one-hot build is
    # independent of t_bc, so bigger is strictly better until VMEM pressure; keep
    # sub-32-bit tiles %16 (bf16 min sublane tile) and 32-bit tiles %8.
    if BC <= cap:
        return BC                 # full-extent block: always layout-legal
    min_mult = 16 if itemsize < 4 else 8
    for t in (512, 384, 256, 128, 64, 32, 16):
        if t <= cap and BC % t == 0 and t % min_mult == 0:
            return t
    return BC                     # fallback: single full-extent block


# ----------------------------- Pallas kernel ---------------------------------

def _fold_kernel(step_p_ref, step_j_ref, step_flag_ref, idx_ref, x_ref, o_ref,
                 *scratch_refs, tp, tj, J, x_is_bf16, split_f32, out_is_f32):
    # scratch_refs is empty when the output dtype is f32: the output block itself
    # (VMEM-resident across its contiguous p-group) doubles as the accumulator.
    acc_ref = o_ref if out_is_f32 else scratch_refs[0]
    s = pl.program_id(1)
    flag = step_flag_ref[s]

    @pl.when((flag & _FLAG_INIT) != 0)
    def _init():
        acc_ref[...] = jnp.zeros_like(acc_ref)

    @pl.when((flag & _FLAG_ACC) != 0)
    def _accumulate():
        # (1, tp) lane iota broadcast against the (tj, 1) idx column: no (tj, tp)
        # iota is ever materialized on the VALU.
        cols = jax.lax.broadcasted_iota(jnp.int32, (1, tp), 1) + step_p_ref[s] * tp
        onehot = idx_ref[...] == cols                               # (tj, tp) bool

        x = x_ref[...]
        if J % tj != 0:
            # The ragged last j-tile is read straight from HBM without padding;
            # zero its out-of-range columns so garbage (possibly NaN/Inf) VMEM
            # never reaches the MXU.  (The -1 idx sentinel only zeroes the
            # one-hot side.)  Compiles out entirely when tj divides J.
            rows = (jax.lax.broadcasted_iota(jnp.int32, (1, tj), 1)
                    + step_j_ref[s] * tj)
            x = jnp.where(rows < J, x, jnp.zeros_like(x))

        if x_is_bf16:
            acc_ref[...] += jnp.dot(x, onehot.astype(jnp.bfloat16),
                                    preferred_element_type=jnp.float32)
        elif split_f32:
            # f32 fast path: 3-term bf16 split of x against the exact (0/1) bf16
            # one-hot with f32 accumulation.  Three bf16-rate MXU passes reproduce
            # f32 accuracy and beat a native f32 matmul on every generation
            # (v7x's MXU has no f32/int path at all).
            oh = onehot.astype(jnp.bfloat16)
            xf = x.astype(jnp.float32)
            hi = xf.astype(jnp.bfloat16)
            r = xf - hi.astype(jnp.float32)
            mid = r.astype(jnp.bfloat16)
            lo = (r - mid.astype(jnp.float32)).astype(jnp.bfloat16)
            part = jnp.dot(hi, oh, preferred_element_type=jnp.float32)
            part = part + jnp.dot(mid, oh, preferred_element_type=jnp.float32)
            part = part + jnp.dot(lo, oh, preferred_element_type=jnp.float32)
            acc_ref[...] += part
        else:
            acc_ref[...] += jnp.dot(x.astype(jnp.float32),
                                    onehot.astype(jnp.float32),
                                    preferred_element_type=jnp.float32,
                                    precision=jax.lax.Precision.HIGHEST)

    if not out_is_f32:  # non-f32 output: cast the f32 accumulator once per group
        @pl.when((flag & _FLAG_FINAL) != 0)
        def _finalize():
            o_ref[...] = acc_ref[...].astype(o_ref.dtype)


# ----------------------------- module wrapper --------------------------------

class FoldNd:
    """JAX/Pallas equivalent of the PyTorch FoldNd module (col2im)."""

    def __init__(self, output_size, kernel_size, dilation=1, padding=0, stride=1,
                 tile_p=None, tile_j=None, tile_bc=None, split_f32=True):
        if not isinstance(output_size, tuple):
            raise ValueError(
                "'output_size' must be tuple. Got %s." % type(output_size)
            )
        self._output_size = tuple(int(o) for o in output_size)
        N = len(self._output_size)
        self._kernel_size = _tuple(kernel_size, N)
        self._dilation = _tuple(dilation, N)
        self._padding = _tuple(padding, N)
        self._stride = _tuple(stride, N)

        self._P = int(np.prod(self._output_size))
        _check_output_size(self._P)
        self._kernel_numel = int(np.prod(self._kernel_size))
        self._split_f32 = bool(split_f32)

        idx = _build_fold_indices(
            self._output_size, self._kernel_size, self._dilation,
            self._padding, self._stride,
        )
        self._J = int(idx.shape[0])
        self._idx = idx  # kept for reference / testing

        # --- static tiling decisions -------------------------------------------
        kind = _device_kind()
        self._kind = kind
        self._tp = int(tile_p) if tile_p else _choose_tp(self._P, kind)
        self._tj = int(tile_j) if tile_j else _choose_tj(self._J, kind)
        self._tbc_cap = int(tile_bc) if tile_bc else (256 if "v5" in kind else 512)
        self._Pp = -(-self._P // self._tp) * self._tp
        self._Jp = -(-self._J // self._tj) * self._tj

        # idx padded with a -1 sentinel (never matches an output column), laid out
        # as a (Jp, 1) column so a (tj, 1) block broadcasts against the lane iota.
        idx_pad = np.full(self._Jp, -1, np.int32)
        idx_pad[: self._J] = idx
        self._idx_col = jnp.asarray(idx_pad.reshape(self._Jp, 1))

        # --- flattened (p-tile, j-tile) schedule (the big lever) ---------------
        # Exactly one grid step per contributing pair: skewed overlap counts no
        # longer pay per-step grid overhead for skipped work.  Steps of a p-group
        # are contiguous, so its output block stays VMEM-resident for the whole
        # reduction; the SMEM tables drive the data-dependent index_maps.
        num_j = self._Jp // self._tj
        num_p = self._Pp // self._tp
        tiles = idx_pad.reshape(num_j, self._tj)
        valid = tiles >= 0
        tmin = np.where(valid, tiles, np.iinfo(np.int32).max).min(axis=1)
        tmax = np.where(valid, tiles, np.iinfo(np.int32).min).max(axis=1)

        step_p, step_j, step_flag = [], [], []
        for pb in range(num_p):
            lo, hi = pb * self._tp, (pb + 1) * self._tp - 1
            js = np.nonzero((tmax >= lo) & (tmin <= hi))[0].tolist()
            if pb % 2 == 1:
                js = js[::-1]  # serpentine: boundary j-tile DMA reused across groups
            if not js:
                # p-tile receives no contributions: one step that only zeroes it.
                step_p.append(pb)
                step_j.append(step_j[-1] if step_j else 0)
                step_flag.append(_FLAG_INIT | _FLAG_FINAL)
                continue
            for k, jb in enumerate(js):
                fl = _FLAG_ACC
                if k == 0:
                    fl |= _FLAG_INIT
                if k == len(js) - 1:
                    fl |= _FLAG_FINAL
                step_p.append(pb)
                step_j.append(int(jb))
                step_flag.append(fl)

        self._n_steps = len(step_p)
        self._num_p = num_p
        self._step_p = jnp.asarray(np.asarray(step_p, dtype=np.int32))
        self._step_j = jnp.asarray(np.asarray(step_j, dtype=np.int32))
        self._step_flag = jnp.asarray(np.asarray(step_flag, dtype=np.int32))

    # -------------------------------------------------------------------------

    def _fold_matmul(self, x2, BC, out_dtype):
        tp, tj = self._tp, self._tj
        x_dtype = np.dtype(x2.dtype)
        x_is_bf16 = x_dtype == np.dtype(jnp.bfloat16)
        out_is_f32 = np.dtype(out_dtype) == np.dtype(np.float32)

        t_bc = _choose_tbc(BC, self._tbc_cap, x_dtype.itemsize)
        num_bc = max(1, BC // t_bc)
        # TODO(synk): if num_bc > 1 ever dominates, cache the (tj, tp) one-hot in a
        # VMEM scratch rebuilt only at b == 0 instead of re-deriving it per bc-tile.

        kernel = functools.partial(
            _fold_kernel, tp=tp, tj=tj, J=self._J, x_is_bf16=x_is_bf16,
            split_f32=self._split_f32, out_is_f32=out_is_f32)

        idx_spec = pl.BlockSpec((tj, 1), lambda b, s, sp, sj, fl: (sj[s], 0))
        x_spec = pl.BlockSpec((t_bc, tj), lambda b, s, sp, sj, fl: (b, sj[s]))
        o_spec = pl.BlockSpec((t_bc, tp), lambda b, s, sp, sj, fl: (b, sp[s]))
        scratch = [] if out_is_f32 else [pltpu.VMEM((t_bc, tp), jnp.float32)]

        # Explicit VMEM budget: double-buffered x / idx / out + f32 accumulator +
        # one-hot & bf16-split temporaries, with headroom, capped safely below
        # v7x's 64 MiB physical VMEM (v5e/v6e have 128 MiB).
        need = (2 * t_bc * tj * x_dtype.itemsize
                + 2 * tj * 128 * 4
                + 2 * t_bc * tp * np.dtype(out_dtype).itemsize
                + (0 if out_is_f32 else t_bc * tp * 4)
                + tj * tp * 4 + 4 * t_bc * max(tj, tp) * 4)
        vmem_limit = int(min(max(2 * need, 32 << 20), 56 << 20))

        return pl.pallas_call(
            kernel,
            out_shape=jax.ShapeDtypeStruct((BC, self._Pp), out_dtype),
            grid_spec=pltpu.PrefetchScalarGridSpec(
                num_scalar_prefetch=3,
                grid=(num_bc, self._n_steps),
                in_specs=[idx_spec, x_spec],
                out_specs=o_spec,
                scratch_shapes=scratch,
            ),
            compiler_params=pltpu.CompilerParams(
                dimension_semantics=("parallel", "arbitrary"),
                vmem_limit_bytes=vmem_limit,
            ),
        )(self._step_p, self._step_j, self._step_flag, self._idx_col, x2)

    def __call__(self, x):
        B = x.shape[0]
        C = x.shape[1] // self._kernel_numel
        BC = B * C
        # (B, C*K, L) -> (B*C, K*L): contiguous reshape, same ordering as torch.
        # No HBM pad of x: a ragged j-tail (J % tj != 0) is masked in-kernel.
        x2 = x.reshape(BC, self._J)
        out = self._fold_matmul(x2, BC, x.dtype)
        if self._Pp != self._P:
            out = out[:, : self._P]
        return out.reshape((B, C) + self._output_size)


# ----------------------------- reference + main -------------------------------

def _fold_ref_jax(x, idx, output_size, kernel_numel):
    B = x.shape[0]
    C = x.shape[1] // kernel_numel
    P = int(np.prod(output_size))
    x2 = x.reshape(B, C, -1).astype(jnp.float32)
    out = jnp.zeros((B, C, P), jnp.float32).at[:, :, jnp.asarray(idx)].add(x2)
    return out.reshape((B, C) + tuple(output_size)).astype(x.dtype)


if __name__ == "__main__":
    # torch.nn.Fold-consistent small shapes:
    # output_size=(16,16), kernel=3, padding=1, stride=1 -> L = 16*16 = 256,
    # input = (B, C*9, L) = (2, 36, 256), output = (2, 4, 16, 16).
    B, C = 2, 4
    output_size = (16, 16)
    kernel_size, padding, stride, dilation = 3, 1, 1, 1

    fold = FoldNd(output_size, kernel_size, dilation=dilation,
                  padding=padding, stride=stride)

    L = int(np.prod([
        (output_size[i] + 2 * padding - dilation * (kernel_size - 1) - 1) // stride + 1
        for i in range(len(output_size))
    ]))
    key = jax.random.PRNGKey(0)
    k1, k2 = jax.random.split(key)
    x = jax.random.normal(k1, (B, C * kernel_size ** 2, L), dtype=jnp.float32)

    # f32 path: 3-term bf16 split on the MXU, f32 accumulation in the resident
    # output block (no scratch).
    out = jax.block_until_ready(fold(x))
    ref = jax.block_until_ready(
        _fold_ref_jax(x, fold._idx, output_size, fold._kernel_numel))
    assert out.shape == (B, C) + output_size, out.shape
    np.testing.assert_allclose(np.asarray(out), np.asarray(ref), rtol=1e-5, atol=1e-5)

    # bf16 path: bf16 one-hot + f32 scratch accumulator, cast once at the end.
    x_bf16 = x.astype(jnp.bfloat16)
    out_bf16 = jax.block_until_ready(fold(x_bf16))
    ref_bf16 = jax.block_until_ready(
        _fold_ref_jax(x_bf16, fold._idx, output_size, fold._kernel_numel))
    np.testing.assert_allclose(
        np.asarray(out_bf16.astype(jnp.float32)),
        np.asarray(ref_bf16.astype(jnp.float32)),
        rtol=5e-2, atol=5e-2,
    )

    # Strided case: J = 9 * 64 = 576 is not a multiple of 128/256, exercising the
    # in-kernel ragged-tail mask (x is NOT padded in HBM).
    fold_s2 = FoldNd(output_size, 3, dilation=1, padding=1, stride=2)
    L2 = int(np.prod([(16 + 2 - 2 - 1) // 2 + 1] * 2))
    x_s2 = jax.random.normal(k2, (B, C * 9, L2), dtype=jnp.float32)
    out_s2 = jax.block_until_ready(fold_s2(x_s2))
    ref_s2 = jax.block_until_ready(
        _fold_ref_jax(x_s2, fold_s2._idx, output_size, fold_s2._kernel_numel))
    np.testing.assert_allclose(np.asarray(out_s2), np.asarray(ref_s2),
                               rtol=1e-5, atol=1e-5)

    print("KERNEL_OK")
</pallas_src>

<mosaic_0001>
module attributes {stable_mosaic.version = 11 : i64} {
  func.func @_fold_kernel(%arg0: i32, %arg1: i32, %arg2: memref<9xi32, #tpu.memory_space<smem>>, %arg3: memref<9xi32, #tpu.memory_space<smem>>, %arg4: memref<9xi32, #tpu.memory_space<smem>>, %arg5: memref<256x1xi32, #tpu.memory_space<vmem>>, %arg6: memref<8x256xf32, #tpu.memory_space<vmem>>, %arg7: memref<8x256xf32, #tpu.memory_space<vmem>>) attributes {dimension_semantics = [#tpu.dimension_semantics<parallel>, #tpu.dimension_semantics<arbitrary>], iteration_bounds = array<i64: 1, 9>, scalar_prefetch = 3 : i64, scratch_operands = 0 : i64, tpu.core_type = #tpu.core_type<tc>, window_params = [{transform_indices = @transform_0, window_bounds = array<i64: 256, 1>}, {transform_indices = @transform_1, window_bounds = array<i64: 8, 256>}, {transform_indices = @transform_2, window_bounds = array<i64: 8, 256>}]} {
    %0 = arith.index_cast %arg1 : i32 to index
    %1 = memref.load %arg4[%0] : memref<9xi32, #tpu.memory_space<smem>>
    %c1_i32 = arith.constant 1 : i32
    %2 = arith.andi %1, %c1_i32 : i32
    %c0_i32 = arith.constant 0 : i32
    %3 = arith.cmpi ne, %2, %c0_i32 : i32
    %4 = arith.extui %3 : i1 to i32
    %c0_i32_0 = arith.constant 0 : i32
    %5 = arith.cmpi ne, %4, %c0_i32_0 : i32
    scf.if %5 {
      %cst = arith.constant 0.000000e+00 : f32
      %10 = vector.broadcast %cst : f32 to vector<8x256xf32>
      %c0 = arith.constant 0 : index
      %c0_3 = arith.constant 0 : index
      %11 = vector.load %arg7[%c0, %c0_3] : memref<8x256xf32, #tpu.memory_space<vmem>>, vector<8x256xf32>
      tpu.vector_store %arg7[%c0, %c0_3], %10 {strides = array<i32>} : memref<8x256xf32, #tpu.memory_space<vmem>>, vector<8x256xf32>,
    } else {
    }
    %c2_i32 = arith.constant 2 : i32
    %6 = arith.andi %1, %c2_i32 : i32
    %c0_i32_1 = arith.constant 0 : i32
    %7 = arith.cmpi ne, %6, %c0_i32_1 : i32
    %8 = arith.extui %7 : i1 to i32
    %c0_i32_2 = arith.constant 0 : i32
    %9 = arith.cmpi ne, %8, %c0_i32_2 : i32
    scf.if %9 {
      %10 = tpu.iota {dimensions = array<i32: 1>} : vector<1x256xi32>
      %11 = arith.index_cast %arg1 : i32 to index
      %12 = memref.load %arg2[%11] : memref<9xi32, #tpu.memory_space<smem>>
      %c256_i32 = arith.constant 256 : i32
      %13 = arith.muli %12, %c256_i32 : i32
      %14 = vector.broadcast %13 : i32 to vector<1x256xi32>
      %15 = arith.addi %10, %14 : vector<1x256xi32>
      %c0 = arith.constant 0 : index
      %c0_3 = arith.constant 0 : index
      %16 = vector.load %arg5[%c0, %c0_3] : memref<256x1xi32, #tpu.memory_space<vmem>>, vector<256x1xi32>
      %17 = vector.broadcast %16 : vector<256x1xi32> to vector<256x256xi32>
      %18 = vector.broadcast %15 : vector<1x256xi32> to vector<256x256xi32>
      %19 = arith.cmpi eq, %17, %18 : vector<256x256xi32>
      %c0_4 = arith.constant 0 : index
      %c0_5 = arith.constant 0 : index
      %20 = vector.load %arg6[%c0_4, %c0_5] : memref<8x256xf32, #tpu.memory_space<vmem>>, vector<8x256xf32>
      %21 = arith.extui %19 : vector<256x256xi1> to vector<256x256xi32>
      %22 = arith.sitofp %21 : vector<256x256xi32> to vector<256x256xf32>
      %23 = arith.truncf %22 : vector<256x256xf32> to vector<256x256xbf16>
      %24 = arith.truncf %20 : vector<8x256xf32> to vector<8x256xbf16>
      %25 = arith.extf %24 : vector<8x256xbf16> to vector<8x256xf32>
      %26 = arith.subf %20, %25 : vector<8x256xf32>
      %27 = arith.truncf %26 : vector<8x256xf32> to vector<8x256xbf16>
      %28 = arith.extf %27 : vector<8x256xbf16> to vector<8x256xf32>
      %29 = arith.subf %26, %28 : vector<8x256xf32>
      %30 = arith.truncf %29 : vector<8x256xf32> to vector<8x256xbf16>
      %cst = arith.constant dense<0.000000e+00> : vector<8x256xf32>
      %31 = tpu.matmul %24, %23, %cst {dimension_numbers = #tpu.dot_dimension_numbers<[1], [0], [0], [1], [0, 0, 1, 1], [], []>} : vector<8x256xbf16>, vector<256x256xbf16>, vector<8x256xf32> -> vector<8x256xf32>
      %cst_6 = arith.constant dense<0.000000e+00> : vector<8x256xf32>
      %32 = tpu.matmul %27, %23, %cst_6 {dimension_numbers = #tpu.dot_dimension_numbers<[1], [0], [0], [1], [0, 0, 1, 1], [], []>} : vector<8x256xbf16>, vector<256x256xbf16>, vector<8x256xf32> -> vector<8x256xf32>
      %33 = arith.addf %31, %32 : vector<8x256xf32>
      %cst_7 = arith.constant dense<0.000000e+00> : vector<8x256xf32>
      %34 = tpu.matmul %30, %23, %cst_7 {dimension_numbers = #tpu.dot_dimension_numbers<[1], [0], [0], [1], [0, 0, 1, 1], [], []>} : vector<8x256xbf16>, vector<256x256xbf16>, vector<8x256xf32> -> vector<8x256xf32>
      %35 = arith.addf %33, %34 : vector<8x256xf32>
      %c0_8 = arith.constant 0 : index
      %c0_9 = arith.constant 0 : index
      %36 = vector.load %arg7[%c0_8, %c0_9] : memref<8x256xf32, #tpu.memory_space<vmem>>, vector<8x256xf32>
      %37 = arith.addf %36, %35 : vector<8x256xf32>
      %c0_10 = arith.constant 0 : index
      %c0_11 = arith.constant 0 : index
      %38 = vector.load %arg7[%c0_10, %c0_11] : memref<8x256xf32, #tpu.memory_space<vmem>>, vector<8x256xf32>
      tpu.vector_store %arg7[%c0_10, %c0_11], %37 {strides = array<i32>} : memref<8x256xf32, #tpu.memory_space<vmem>>, vector<8x256xf32>,
    } else {
    }
    return
  }
  func.func @transform_0(%arg0: i32, %arg1: i32, %arg2: memref<9xi32, #tpu.memory_space<smem>>, %arg3: memref<9xi32, #tpu.memory_space<smem>>, %arg4: memref<9xi32, #tpu.memory_space<smem>>) -> (i32, i32) {
    %0 = arith.index_cast %arg1 : i32 to index
    %1 = memref.load %arg3[%0] : memref<9xi32, #tpu.memory_space<smem>>
    %c0_i32 = arith.constant 0 : i32
    %c0_i32_0 = arith.constant 0 : i32
    return %1, %c0_i32 : i32, i32
  }
  func.func @transform_1(%arg0: i32, %arg1: i32, %arg2: memref<9xi32, #tpu.memory_space<smem>>, %arg3: memref<9xi32, #tpu.memory_space<smem>>, %arg4: memref<9xi32, #tpu.memory_space<smem>>) -> (i32, i32) {
    %0 = arith.index_cast %arg1 : i32 to index
    %1 = memref.load %arg3[%0] : memref<9xi32, #tpu.memory_space<smem>>
    %c0_i32 = arith.constant 0 : i32
    return %arg0, %1 : i32, i32
  }
  func.func @transform_2(%arg0: i32, %arg1: i32, %arg2: memref<9xi32, #tpu.memory_space<smem>>, %arg3: memref<9xi32, #tpu.memory_space<smem>>, %arg4: memref<9xi32, #tpu.memory_space<smem>>) -> (i32, i32) {
    %0 = arith.index_cast %arg1 : i32 to index
    %1 = memref.load %arg2[%0] : memref<9xi32, #tpu.memory_space<smem>>
    %c0_i32 = arith.constant 0 : i32
    return %arg0, %1 : i32, i32
  }
}

</mosaic_0001>

<bundles_post_ra>
// kernel: tpu_custom_call.1
= control target key start
LH: loop header
LB: loop body
LE: loop exit
PB: predicated region body
PF: predicated region fallthrough
CT: control target
= control target key end

     0   :  { %s2004_s0 = inlined_call_operand.vmem [shape: s32[9], index: 0, kind: input, shape index: {}]   ;;  %s2005_s3 = inlined_call_operand.vmem [shape: s32[2304,1], index: 3, kind: input, shape index: {}]   ;;  %s2006_s4 = inlined_call_operand.vmem [shape: f32[8,2304], index: 4, kind: input, shape index: {}]   ;;  %s2007_s5 = inlined_call_operand.hbm [shape: f32[8,256], index: 5, kind: output, shape index: {}]   ;;  %s2008_s1 = inlined_call_operand.vmem [shape: s32[9], index: 1, kind: input, shape index: {}]   ;;  %s2009_s2 = inlined_call_operand.vmem [shape: s32[9], index: 2, kind: input, shape index: {}]  }
   0x1   :  { %s10_s20 = sshll.u32 %s2004_s0, 4  ;;  %s14_s23 = sshll.u32 %s2008_s1, 4  ;;  %s11_s20 = int_to_ptr.vmem [resolvable:$true] %s10_s20  ;;  %s15_s23 = int_to_ptr.vmem [resolvable:$true] %s14_s23 }
   0x2   :  { %s1195_s24 = scalar_lea.vmem %s11_s20, 16  ;;  %p1200_p1 = scmp.lt.s32.totalorder %s11_s20, %s11_s20 }
   0x3   :  { %p1196_p0 = scmp.ne.s32.totalorder %s11_s20, %s1195_s24  ;;  %p1201_p2 = scmp.lt.s32.totalorder %s1195_s24, %s1195_s24 }
   0x5   :  { %p1202_p3 = por %p1201_p2, %p1200_p1 }
   0x7   :  { %p1203_p4 = pnand %p1202_p3, %p1196_p0 }
   0x9   :  { %1206 = shalt.err (!%p1203_p4)  }
   0xa   :  { %s1311_s25 = smov [#allocation3]   ;;  %s1207_s26 = scalar_lea.vmem %s15_s23, 16 }
   0xb   :  { %13 = dma.vmem_to_smem %s11_s20, 16, %s1311_s25, [#allocation2] }
   0xc   :  { %p1208_p5 = scmp.ne.s32.totalorder %s15_s23, %s1207_s26  ;;  %p1212_p6 = scmp.lt.s32.totalorder %s15_s23, %s15_s23 }
   0xd   :  { %p1213_p7 = scmp.lt.s32.totalorder %s1207_s26, %s1207_s26 }
   0xf   :  { %p1214_p8 = por %p1213_p7, %p1212_p6 }
  0x11   :  { %p1215_p9 = pnand %p1214_p8, %p1208_p5 }
  0x13   :  { %1218 = shalt.err (!%p1215_p9)  }
  0x14   :  { %s1312_s0 = smov [#allocation4]   ;;  %s18_s28 = sshll.u32 %s2009_s2, 4  ;;  %s19_s28 = int_to_ptr.vmem [resolvable:$true] %s18_s28 }
  0x15   :  { %17 = dma.vmem_to_smem %s15_s23, 16, %s1312_s0, [#allocation2] }
  0x16   :  { %s1219_s29 = scalar_lea.vmem %s19_s28, 16  ;;  %p1224_p11 = scmp.lt.s32.totalorder %s19_s28, %s19_s28 }
  0x17   :  { %p1220_p10 = scmp.ne.s32.totalorder %s19_s28, %s1219_s29  ;;  %p1225_p12 = scmp.lt.s32.totalorder %s1219_s29, %s1219_s29 }
  0x19   :  { %p1226_p13 = por %p1225_p12, %p1224_p11 }
  0x1b   :  { %p1227_p0 = pnand %p1226_p13, %p1220_p10 }
  0x1d   :  { %1230 = shalt.err (!%p1227_p0)  }
  0x1e   :  { %s1313_s30 = smov [#allocation5]  }
  0x1f   :  { %21 = dma.vmem_to_smem %s19_s28, 16, %s1313_s30, [#allocation2] }
  0x20   :  { %1281 = dma.done.wait [#allocation2], 48 }
  0x21   :  { %1282 = vsyncadd [#allocation2], 4294967248 }
  0x22   :  { %23 = sfence }
  0x23   :  { %24 = vsyncpa [#allocation7], 0 }
  0x24   :  { %26 = vsyncpa [#allocation7 + $0x1], 0  ;;  %s1357_s6 = smov 0   ;;  %s1359_s7 = smov 0  }
  0x25   :  { %s1361_s2 = smov 0   ;;  %s1363_s8 = smov 0  }
  0x26   :  { %s1365_s9 = smov 0   ;;  %s1367_s10 = smov 0  }
  0x27 LB: > { %s855_s11 = sadd.s32 4294967295, %s1309_s10   ;;  %s856_s12 = sadd.s32 4294967294, %s1309_s10   ;;  %s1309_s10 = sphi %s1367_s10, %s32_s10   ;;  %s1305_s9 = sphi %s1365_s9, %s2122_s9   ;;  %s1301_s8 = sphi %s1363_s8, %s2121_s8   ;;  %s1297_s2 = sphi %s1361_s2, %s2120_s2   ;;  %s1293_s7 = sphi %s1359_s7, %s2119_s7   ;;  %s1289_s6 = sphi %s1357_s6, %s2118_s6  }
  0x28   : > { %s41_s13 = sadd.s32 1, %s1305_s9  ;;  %s106_s14 = sld [smem:[#allocation3 + %s1305_s9]] }
  0x29   : > { %p42_p1 = scmp.ge.s32.totalorder %s41_s13, 9  ;;  %p123_p2 = scmp.ne.s32.totalorder %s1297_s2, %s1293_s7 }
  0x2a   : > { %p124_p3 = scmp.eq.s32.totalorder %s855_s11, 8  ;;  %p129_p5 = scmp.ne.s32.totalorder %s1293_s7, %s1289_s6 }
  0x2b   : > { %s2124_s13 = smov (%p42_p1, %s41_s13), 0  ;;  %p130_p6 = scmp.eq.s32.totalorder %s856_s12, 8 }
  0x2c   : > { %p1395_p4 = por %p124_p3, %p123_p2  ;;  %s107_s16 = sld [smem:[#allocation3 + %s2124_s13]] }
  0x2d   : > { %p859_p7 = scmp.ge.s32.totalorder %s1309_s10, 1  ;;  %p174_p8 = scmp.lt.s32.totalorder %s1309_s10, 10 }
  0x2e   : > { %p1404_p9 = por %p130_p6, %p129_p5  ;;  %s113_s19 = sadd.s32 1, %s1297_s2 }
  0x2f   : > { %p175_p10 = pnand %p859_p7, %p174_p8 }
  0x30   : > { %s204_s21 = sand.u32 (!%p175_p10), 1, %s1293_s7   ;;  %s207_s22 = sld [smem:[#allocation4 + %s1301_s8]] (!%p175_p10) }
  0x31   : > { %178 = sbr.rel (%p175_p10) target bundleno = 561 (0x231), region = 28  ;;  %s860_s23 = sshll.u32 (!%p175_p10), %s204_s21, 4 }
  0x32   : > { %s109_s18 = ssub.s32 %s106_s14, %s107_s16  ;;  %s215_s24 = sld [smem:[#allocation4 + %s1301_s8]] (!%p175_p10) }
  0x33   : > { %p111_p11 = scmp.eq.s32.totalorder %s109_s18, 0  ;;  %s229_s25 = sld [smem:[#allocation5 + %s1301_s8]] (!%p175_p10) }
  0x34   : > { %s1428_s18 = scalar_lea.vmem (!%p175_p10), [#allocation6], %s860_s23 }
  0x35   : > { %s1410_s20 = scalar_select %p111_p11, %s1297_s2, %s113_s19  }
  0x36   : > { %s861_s26 = sshll.u32 %s207_s22, 5 }
  0x37   : > { %p209_p12 = scmp.lt.s32.totalorder %s861_s26, 287 }
  0x38   : > { %s863_s0 = sshll.u32 %s215_s24, 1 }
  0x39   : > { %p219_p13 = scmp.lt.s32.totalorder %s863_s0, 17  ;;  %s230_s1 = sand.u32 1, %s229_s25 }
  0x3a   : > { %s2126_s26 = smov (!%p209_p12, %s861_s26), 287  ;;  %p865_p0 = scmp.eq.s32.totalorder %s230_s1, 0 }
  0x3b   : > { %s2128_s0 = smov (!%p219_p13, %s863_s0), 17  ;;  %s862_s27 = sshll.u32 %s2126_s26, 3 }
  0x3c   : > { %s1421_s30 = scalar_lea.vmem %s2005_s3, %s862_s27  ;;  %s864_s11 = sshll.u32 %s2128_s0, 3 }
  0x3d   : > { %s1426_s16 = scalar_lea.vmem %s2006_s4, %s864_s11  ;;  %234 = sbr.rel (%p865_p0) target bundleno = 68 (0x44), region = 32 }
  0x42   : > { %v1314_v0 = vmov 0.0  }
  0x43   : > { %235 = vst [vmem:[%s1428_s18] sm:$0xff] %v1314_v0  ;;  %236 = vst [vmem:[%s1428_s18 + $0x8] sm:$0xff] %v1314_v0 }
  0x44 PF: > { %s237_s19 = sand.u32 2, %s229_s25 }
  0x45   : > { %p866_p1 = scmp.eq.s32.totalorder %s237_s19, 0 }
  0x46   : > { %s245_s22 = sld [smem:[#allocation3 + %s1301_s8]] (!%p866_p1) }
  0x47   : > { %241 = sbr.rel (%p866_p1) target bundleno = 536 (0x218), region = 36 }
  0x4c   : > { %v264_v1 = vld [vmem:[%s1421_s30 + $0x70] sm:$0xff]  ;;  %v262_v2 = vld [vmem:[%s1421_s30 + $0x60] sm:$0xff]  ;;  %v1315_v3 = vmov 0   ;;  %v265_v4 = vld [vmem:[%s1421_s30 + $0x78] sm:$0xff]  ;;  %v242_v39 = vlaneseq  ;;  %s867_s23 = sshll.u32 %s245_s22, 8 }
  0x4d   : > { %1194 = vset.pattern.permute.xlu1 %v1315_v3  ;;  %1193 = vset.pattern.permute.xlu0 %v1315_v3  ;;  %v263_v5 = vld [vmem:[%s1421_s30 + $0x68] sm:$0xff]  ;;  %v261_v6 = vld [vmem:[%s1421_s30 + $0x58] sm:$0xff]  ;;  %v260_v7 = vld [vmem:[%s1421_s30 + $0x50] sm:$0xff]  ;;  %v247_v43 = vstv %s867_s23  ;;  %v1316_v54 = vmov 1.0|1.0   ;;  %v2047_v3 = vmov 0 }
  0x4e   : > { %325 = vperm.xlu0 %1193, %v264_v1   ;;  %319 = vperm.xlu1 %1194, %v262_v2   ;;  %v259_v8 = vld [vmem:[%s1421_s30 + $0x48] sm:$0xff]  ;;  %v258_v9 = vld [vmem:[%s1421_s30 + $0x40] sm:$0xff]  ;;  %v257_v10 = vld [vmem:[%s1421_s30 + $0x38] sm:$0xff]  ;;  %v243_v40 = vand.u32 127, %v242_v39 }
  0x4f   : > { %v256_v11 = vld [vmem:[%s1421_s30 + $0x30] sm:$0xff]  ;;  %v255_v12 = vld [vmem:[%s1421_s30 + $0x28] sm:$0xff]  ;;  %v254_v13 = vld [vmem:[%s1421_s30 + $0x20] sm:$0xff] }
  0x50   : > { %v253_v14 = vld [vmem:[%s1421_s30 + $0x18] sm:$0xff]  ;;  %v252_v15 = vld [vmem:[%s1421_s30 + $0x10] sm:$0xff]  ;;  %v251_v16 = vld [vmem:[%s1421_s30 + $0x8] sm:$0xff]  ;;  %v244_v41 = vadd.s32 128, %v243_v40  ;;  %v1468_v47 = vadd.s32 %v247_v43, %v243_v40  ;;  %v2083_v40 = vmov 0 }
  0x51   : > { %v250_v17 = vld [vmem:[%s1421_s30] sm:$0xff]  ;;  %v281_v18 = vld [vmem:[%s1421_s30 + $0xf8] sm:$0xff]  ;;  %v280_v19 = vld [vmem:[%s1421_s30 + $0xf0] sm:$0xff] }
  0x52   : > { %328 = vperm.xlu0 %1193, %v265_v4   ;;  %322 = vperm.xlu1 %1194, %v263_v5   ;;  %v279_v20 = vld [vmem:[%s1421_s30 + $0xe8] sm:$0xff]  ;;  %v278_v21 = vld [vmem:[%s1421_s30 + $0xe0] sm:$0xff]  ;;  %v277_v22 = vld [vmem:[%s1421_s30 + $0xd8] sm:$0xff]  ;;  %v1466_v46 = vadd.s32 %v247_v43, %v244_v41  ;;  %v2049_v4 = vmov 0 }
  0x53   : > { %v276_v23 = vld [vmem:[%s1421_s30 + $0xd0] sm:$0xff]  ;;  %v275_v24 = vld [vmem:[%s1421_s30 + $0xc8] sm:$0xff]  ;;  %v274_v25 = vld [vmem:[%s1421_s30 + $0xc0] sm:$0xff] }
  0x54   : > { %v273_v26 = vld [vmem:[%s1421_s30 + $0xb8] sm:$0xff]  ;;  %v272_v27 = vld [vmem:[%s1421_s30 + $0xb0] sm:$0xff]  ;;  %v271_v28 = vld [vmem:[%s1421_s30 + $0xa8] sm:$0xff] }
  0x55   : > { %v270_v29 = vld [vmem:[%s1421_s30 + $0xa0] sm:$0xff]  ;;  %v269_v30 = vld [vmem:[%s1421_s30 + $0x98] sm:$0xff]  ;;  %v268_v31 = vld [vmem:[%s1421_s30 + $0x90] sm:$0xff] }
  0x56   : > { %316 = vperm.xlu1 %1194, %v261_v6   ;;  %313 = vperm.xlu0 %1193, %v260_v7   ;;  %v267_v32 = vld [vmem:[%s1421_s30 + $0x88] sm:$0xff]  ;;  %v266_v33 = vld [vmem:[%s1421_s30 + $0x80] sm:$0xff]  ;;  %v2051_v7 = vmov 0 }
  0x57   : > { %v443_v34 = vld [vmem:[%s1426_s16 + $0x8] sm:$0xff] }
  0x58   : > { %v605_v35 = vpack.c.bf16 %v443_v34, %v443_v34 }
  0x5a   : > { %310 = vperm.xlu1 %1194, %v259_v8   ;;  %307 = vperm.xlu0 %1193, %v258_v9   ;;  %v607_v36 = vunpack.c.l.bf16 %v605_v35  ;;  %v2053_v8 = vmov 0 }
  0x5b   : > { %691 = vmatprep.mubr.bf16.mxu1 %v605_v35  ;;  %v2079_v35 = vmov 0 }
  0x5c   : > { %v609_v37 = vsub.f32 %v443_v34, %v607_v36  ;;  %v2081_v36 = vmov 0 }
  0x5e   : > { %304 = vperm.xlu1 %1194, %v257_v10   ;;  %301 = vperm.xlu0 %1193, %v256_v11   ;;  %v611_v38 = vpack.c.bf16 %v609_v37, %v609_v37  ;;  %v2055_v11 = vmov 0 }
  0x60   : > { %650 = vmatprep.mubr.bf16.mxu0 %v611_v38  ;;  %v613_v45 = vunpack.c.l.bf16 %v611_v38 }
  0x62   : > { %298 = vperm.xlu1 %1194, %v255_v12   ;;  %295 = vperm.xlu0 %1193, %v254_v13   ;;  %v1472_v50 = vsub.f32 %v609_v37, %v613_v45  ;;  %v2057_v12 = vmov 0  ;;  %v442_v37 = vld [vmem:[%s1426_s16] sm:$0xff]  ;;  %v2087_v45 = vmov 0 }
  0x63   : > { %v604_v41 = vpack.c.bf16 %v442_v37, %v442_v37 }
  0x66   : > { %292 = vperm.xlu1 %1194, %v253_v14   ;;  %289 = vperm.xlu0 %1193, %v252_v15   ;;  %v2059_v15 = vmov 0 }
  0x6a   : > { %286 = vperm.xlu1 %1194, %v251_v16   ;;  %283 = vperm.xlu0 %1193, %v250_v17   ;;  %v2061_v16 = vmov 0 }
  0x6e   : > { %376 = vperm.xlu1 %1194, %v281_v18   ;;  %373 = vperm.xlu0 %1193, %v280_v19   ;;  %v2063_v19 = vmov 0 }
  0x72   : > { %370 = vperm.xlu1 %1194, %v279_v20   ;;  %367 = vperm.xlu0 %1193, %v278_v21   ;;  %v2065_v20 = vmov 0 }
  0x76   : > { %364 = vperm.xlu1 %1194, %v277_v22   ;;  %361 = vperm.xlu0 %1193, %v276_v23   ;;  %v2067_v23 = vmov 0 }
  0x7a   : > { %358 = vperm.xlu1 %1194, %v275_v24   ;;  %355 = vperm.xlu0 %1193, %v274_v25   ;;  %v2069_v24 = vmov 0 }
  0x7e   : > { %352 = vperm.xlu1 %1194, %v273_v26   ;;  %349 = vperm.xlu0 %1193, %v272_v27   ;;  %v2071_v27 = vmov 0 }
  0x82   : > { %346 = vperm.xlu1 %1194, %v271_v28   ;;  %343 = vperm.xlu0 %1193, %v270_v29   ;;  %v2073_v28 = vmov 0 }
  0x86   : > { %340 = vperm.xlu1 %1194, %v269_v30   ;;  %337 = vperm.xlu0 %1193, %v268_v31   ;;  %v2075_v31 = vmov 0 }
  0x8a   : > { %334 = vperm.xlu1 %1194, %v267_v32   ;;  %331 = vperm.xlu0 %1193, %v266_v33   ;;  %v2077_v32 = vmov 0 }
  0xc9   : > { %v326_v42 = vpop.permute.xlu0 %325  ;;  %v320_v44 = vpop.permute.xlu1 %319 }
  0xca   : > { %vm407_vm2 = vcmp.eq.s32.totalorder %v326_v42, %v1466_v46  ;;  %vm403_vm3 = vcmp.eq.s32.totalorder %v320_v44, %v1466_v46  ;;  %vm406_vm5 = vcmp.eq.s32.totalorder %v326_v42, %v1468_v47  ;;  %vm402_vm8 = vcmp.eq.s32.totalorder %v320_v44, %v1468_v47 }
  0xcb   : > { %v2085_v42 = vmov 0 }
  0xcd   : > { %v329_v48 = vpop.permute.xlu0 %328  ;;  %v323_v49 = vpop.permute.xlu1 %322 }
  0xce   : > { %vm409_vm0 = vcmp.eq.s32.totalorder %v329_v48, %v1466_v46  ;;  %vm408_vm1 = vcmp.eq.s32.totalorder %v329_v48, %v1468_v47  ;;  %vm405_vm4 = vcmp.eq.s32.totalorder %v323_v49, %v1466_v46  ;;  %vm404_vm9 = vcmp.eq.s32.totalorder %v323_v49, %v1468_v47 }
  0xcf   : > { %vm1478_vm6 = vmpackc.low %vm409_vm0, %vm407_vm2  ;;  %v606_v48 = vunpack.c.l.bf16 %v604_v41 }
  0xd0   : > { %933 = vmatprep.subr.msk.bf16.mxu0 %vm1478_vm6, %v1316_v54  ;;  %997 = vmatprep.subr.msk.bf16.mxu1 %vm1478_vm6, %v1316_v54  ;;  %vm1488_vm7 = vmpackc.low %vm408_vm1, %vm406_vm5 }
  0xd1   : > { %v317_v52 = vpop.permute.xlu1 %316  ;;  %v314_v53 = vpop.permute.xlu0 %313  ;;  %vm1494_vm10 = vmpackc.low %vm405_vm4, %vm403_vm3  ;;  %935 = vmatpush1.bf16.msk.msra.mxu0 %vm1488_vm7, %v1316_v54  ;;  %999 = vmatpush1.bf16.msk.msra.mxu1 %vm1488_vm7, %v1316_v54 }
  0xd2   : > { %vm401_vm11 = vcmp.eq.s32.totalorder %v317_v52, %v1466_v46  ;;  %vm399_vm12 = vcmp.eq.s32.totalorder %v314_v53, %v1466_v46  ;;  %937 = vmatprep.subr.msk.bf16.mxu0 %vm1494_vm10, %v1316_v54  ;;  %1001 = vmatprep.subr.msk.bf16.mxu1 %vm1494_vm10, %v1316_v54  ;;  %vm1512_vm13 = vmpackc.low %vm404_vm9, %vm402_vm8  ;;  %vm400_vm14 = vcmp.eq.s32.totalorder %v317_v52, %v1468_v47 }
  0xd3   : > { %vm398_vm15 = vcmp.eq.s32.totalorder %v314_v53, %v1468_v47  ;;  %vm1518_vm0 = vmpackc.low %vm401_vm11, %vm399_vm12  ;;  %v608_v53 = vsub.f32 %v442_v37, %v606_v48 }
  0xd4   : > { %vm1536_vm3 = vmpackc.low %vm400_vm14, %vm398_vm15 }
  0xd5   : > { %v311_v57 = vpop.permute.xlu1 %310  ;;  %v308_v58 = vpop.permute.xlu0 %307  ;;  %939 = vmatpush1.bf16.msk.msra.mxu0 %vm1512_vm13, %v1316_v54  ;;  %1003 = vmatpush1.bf16.msk.msra.mxu1 %vm1512_vm13, %v1316_v54 }
  0xd6   : > { %vm397_vm1 = vcmp.eq.s32.totalorder %v311_v57, %v1466_v46  ;;  %vm395_vm2 = vcmp.eq.s32.totalorder %v308_v58, %v1466_v46  ;;  %941 = vmatprep.subr.msk.bf16.mxu0 %vm1518_vm0, %v1316_v54  ;;  %1005 = vmatprep.subr.msk.bf16.mxu1 %vm1518_vm0, %v1316_v54  ;;  %vm396_vm4 = vcmp.eq.s32.totalorder %v311_v57, %v1468_v47 }
  0xd7   : > { %vm394_vm5 = vcmp.eq.s32.totalorder %v308_v58, %v1468_v47  ;;  %vm1542_vm8 = vmpackc.low %vm397_vm1, %vm395_vm2  ;;  %v617_v58 = vpack.c.bf16 %v1472_v50, %v1472_v50 }
  0xd8   : > { %vm1560_vm12 = vmpackc.low %vm396_vm4, %vm394_vm5 }
  0xd9   : > { %v305_v61 = vpop.permute.xlu1 %304  ;;  %v302_v62 = vpop.permute.xlu0 %301  ;;  %943 = vmatpush1.bf16.msk.msra.mxu0 %vm1536_vm3, %v1316_v54  ;;  %1007 = vmatpush1.bf16.msk.msra.mxu1 %vm1536_vm3, %v1316_v54  ;;  %v2048_v3 = vsel %vm1560_vm12, 4294967295, %v2047_v3 }
  0xda   : > { %vm393_vm9 = vcmp.eq.s32.totalorder %v305_v61, %v1466_v46  ;;  %vm391_vm11 = vcmp.eq.s32.totalorder %v302_v62, %v1466_v46  ;;  %945 = vmatprep.subr.msk.bf16.mxu0 %vm1542_vm8, %v1316_v54  ;;  %1009 = vmatprep.subr.msk.bf16.mxu1 %vm1542_vm8, %v1316_v54  ;;  %vm392_vm14 = vcmp.eq.s32.totalorder %v305_v61, %v1468_v47 }
  0xdb   : > { %vm390_vm15 = vcmp.eq.s32.totalorder %v302_v62, %v1468_v47  ;;  %vm1566_vm1 = vmpackc.low %vm393_vm9, %vm391_vm11 }
  0xdc   : > { %v2050_v4 = vsel %vm1566_vm1, 4294967295, %v2049_v4  ;;  %vm1584_vm5 = vmpackc.low %vm392_vm14, %vm390_vm15 }
  0xdd   : > { %v299_v1 = vpop.permute.xlu1 %298  ;;  %v296_v2 = vpop.permute.xlu0 %295  ;;  %947 = vmatpush1.bf16.msk.msra.mxu0 %vm1560_vm12, %v1316_v54  ;;  %1011 = vmatpush1.bf16.msk.msra.mxu1 %vm1560_vm12, %v1316_v54  ;;  %v2052_v7 = vsel %vm1584_vm5, 4294967295, %v2051_v7 }
  0xde   : > { %vm389_vm2 = vcmp.eq.s32.totalorder %v299_v1, %v1466_v46  ;;  %vm387_vm4 = vcmp.eq.s32.totalorder %v296_v2, %v1466_v46  ;;  %949 = vmatprep.subr.msk.bf16.mxu0 %vm1566_vm1, %v1316_v54  ;;  %1013 = vmatprep.subr.msk.bf16.mxu1 %vm1566_vm1, %v1316_v54  ;;  %vm388_vm9 = vcmp.eq.s32.totalorder %v299_v1, %v1468_v47 }
  0xdf   : > { %vm386_vm11 = vcmp.eq.s32.totalorder %v296_v2, %v1468_v47  ;;  %vm1590_vm12 = vmpackc.low %vm389_vm2, %vm387_vm4 }
  0xe0   : > { %v2054_v8 = vsel %vm1590_vm12, 4294967295, %v2053_v8  ;;  %vm1608_vm2 = vmpackc.low %vm388_vm9, %vm386_vm11 }
  0xe1   : > { %v293_v5 = vpop.permute.xlu1 %292  ;;  %v290_v6 = vpop.permute.xlu0 %289  ;;  %951 = vmatpush1.bf16.msk.msra.mxu0 %vm1584_vm5, %v1316_v54  ;;  %1015 = vmatpush1.bf16.msk.msra.mxu1 %vm1584_vm5, %v1316_v54  ;;  %v2056_v11 = vsel %vm1608_vm2, 4294967295, %v2055_v11 }
  0xe2   : > { %vm385_vm14 = vcmp.eq.s32.totalorder %v293_v5, %v1466_v46  ;;  %vm383_vm15 = vcmp.eq.s32.totalorder %v290_v6, %v1466_v46  ;;  %953 = vmatprep.subr.msk.bf16.mxu0 %vm1590_vm12, %v1316_v54  ;;  %1017 = vmatprep.subr.msk.bf16.mxu1 %vm1590_vm12, %v1316_v54  ;;  %vm384_vm4 = vcmp.eq.s32.totalorder %v293_v5, %v1468_v47 }
  0xe3   : > { %vm382_vm5 = vcmp.eq.s32.totalorder %v290_v6, %v1468_v47  ;;  %vm1614_vm1 = vmpackc.low %vm385_vm14, %vm383_vm15 }
  0xe4   : > { %v2058_v12 = vsel %vm1614_vm1, 4294967295, %v2057_v12  ;;  %vm1632_vm14 = vmpackc.low %vm384_vm4, %vm382_vm5 }
  0xe5   : > { %v287_v9 = vpop.permute.xlu1 %286  ;;  %v284_v10 = vpop.permute.xlu0 %283  ;;  %955 = vmatpush1.bf16.msk.msra.mxu0 %vm1608_vm2, %v1316_v54  ;;  %1019 = vmatpush1.bf16.msk.msra.mxu1 %vm1608_vm2, %v1316_v54  ;;  %v2060_v15 = vsel %vm1632_vm14, 4294967295, %v2059_v15 }
  0xe6   : > { %vm381_vm9 = vcmp.eq.s32.totalorder %v287_v9, %v1466_v46  ;;  %vm379_vm11 = vcmp.eq.s32.totalorder %v284_v10, %v1466_v46  ;;  %957 = vmatprep.subr.msk.bf16.mxu0 %vm1614_vm1, %v1316_v54  ;;  %1021 = vmatprep.subr.msk.bf16.mxu1 %vm1614_vm1, %v1316_v54  ;;  %vm380_vm15 = vcmp.eq.s32.totalorder %v287_v9, %v1468_v47 }
  0xe7   : > { %vm378_vm2 = vcmp.eq.s32.totalorder %v284_v10, %v1468_v47  ;;  %vm1638_vm12 = vmpackc.low %vm381_vm9, %vm379_vm11 }
  0xe8   : > { %v2062_v16 = vsel %vm1638_vm12, 4294967295, %v2061_v16  ;;  %vm1656_vm9 = vmpackc.low %vm380_vm15, %vm378_vm2 }
  0xe9   : > { %v377_v13 = vpop.permute.xlu1 %376  ;;  %v374_v14 = vpop.permute.xlu0 %373  ;;  %959 = vmatpush1.bf16.msk.msra.mxu0 %vm1632_vm14, %v1316_v54  ;;  %1023 = vmatpush1.bf16.msk.msra.mxu1 %vm1632_vm14, %v1316_v54  ;;  %v2064_v19 = vsel %vm1656_vm9, 4294967295, %v2063_v19 }
  0xea   : > { %vm441_vm5 = vcmp.eq.s32.totalorder %v377_v13, %v1466_v46  ;;  %vm439_vm4 = vcmp.eq.s32.totalorder %v374_v14, %v1466_v46  ;;  %961 = vmatprep.subr.msk.bf16.mxu0 %vm1638_vm12, %v1316_v54  ;;  %1025 = vmatprep.subr.msk.bf16.mxu1 %vm1638_vm12, %v1316_v54  ;;  %vm440_vm11 = vcmp.eq.s32.totalorder %v377_v13, %v1468_v47 }
  0xeb   : > { %vm438_vm14 = vcmp.eq.s32.totalorder %v374_v14, %v1468_v47  ;;  %vm1662_vm1 = vmpackc.low %vm441_vm5, %vm439_vm4 }
  0xec   : > { %v2066_v20 = vsel %vm1662_vm1, 4294967295, %v2065_v20  ;;  %vm1680_vm5 = vmpackc.low %vm440_vm11, %vm438_vm14 }
  0xed   : > { %v371_v17 = vpop.permute.xlu1 %370  ;;  %v368_v18 = vpop.permute.xlu0 %367  ;;  %963 = vmatpush1.bf16.msk.msra.mxu0 %vm1656_vm9, %v1316_v54  ;;  %1027 = vmatpush1.bf16.msk.msra.mxu1 %vm1656_vm9, %v1316_v54  ;;  %v2068_v23 = vsel %vm1680_vm5, 4294967295, %v2067_v23 }
  0xee   : > { %vm437_vm2 = vcmp.eq.s32.totalorder %v371_v17, %v1466_v46  ;;  %vm435_vm15 = vcmp.eq.s32.totalorder %v368_v18, %v1466_v46  ;;  %965 = vmatprep.subr.msk.bf16.mxu0 %vm1662_vm1, %v1316_v54  ;;  %1029 = vmatprep.subr.msk.bf16.mxu1 %vm1662_vm1, %v1316_v54  ;;  %vm436_vm4 = vcmp.eq.s32.totalorder %v371_v17, %v1468_v47 }
  0xef   : > { %vm434_vm9 = vcmp.eq.s32.totalorder %v368_v18, %v1468_v47  ;;  %vm1686_vm12 = vmpackc.low %vm437_vm2, %vm435_vm15 }
  0xf0   : > { %v2070_v24 = vsel %vm1686_vm12, 4294967295, %v2069_v24  ;;  %vm1704_vm2 = vmpackc.low %vm436_vm4, %vm434_vm9 }
  0xf1   : > { %v365_v21 = vpop.permute.xlu1 %364  ;;  %v362_v22 = vpop.permute.xlu0 %361  ;;  %967 = vmatpush2.bf16.msk.msra.mxu0 %vm1680_vm5, %v1316_v54  ;;  %1031 = vmatpush2.bf16.msk.msra.mxu1 %vm1680_vm5, %v1316_v54  ;;  %v2072_v27 = vsel %vm1704_vm2, 4294967295, %v2071_v27 }
  0xf2   : > { %vm433_vm14 = vcmp.eq.s32.totalorder %v365_v21, %v1466_v46  ;;  %vm431_vm11 = vcmp.eq.s32.totalorder %v362_v22, %v1466_v46  ;;  %969 = vmatprep.subr.msk.bf16.mxu0 %vm1686_vm12, %v1316_v54  ;;  %1033 = vmatprep.subr.msk.bf16.mxu1 %vm1686_vm12, %v1316_v54  ;;  %vm432_vm15 = vcmp.eq.s32.totalorder %v365_v21, %v1468_v47 }
  0xf3   : > { %vm430_vm5 = vcmp.eq.s32.totalorder %v362_v22, %v1468_v47  ;;  %vm1710_vm1 = vmpackc.low %vm433_vm14, %vm431_vm11 }
  0xf4   : > { %v2074_v28 = vsel %vm1710_vm1, 4294967295, %v2073_v28  ;;  %vm1728_vm14 = vmpackc.low %vm432_vm15, %vm430_vm5 }
  0xf5   : > { %v359_v25 = vpop.permute.xlu1 %358  ;;  %v356_v26 = vpop.permute.xlu0 %355  ;;  %971 = vmatpush2.bf16.msk.msra.mxu0 %vm1704_vm2, %v1316_v54  ;;  %1035 = vmatpush2.bf16.msk.msra.mxu1 %vm1704_vm2, %v1316_v54  ;;  %v2076_v31 = vsel %vm1728_vm14, 4294967295, %v2075_v31 }
  0xf6   : > { %vm429_vm9 = vcmp.eq.s32.totalorder %v359_v25, %v1466_v46  ;;  %vm427_vm4 = vcmp.eq.s32.totalorder %v356_v26, %v1466_v46  ;;  %973 = vmatprep.subr.msk.bf16.mxu0 %vm1710_vm1, %v1316_v54  ;;  %1037 = vmatprep.subr.msk.bf16.mxu1 %vm1710_vm1, %v1316_v54  ;;  %vm428_vm11 = vcmp.eq.s32.totalorder %v359_v25, %v1468_v47 }
  0xf7   : > { %vm426_vm2 = vcmp.eq.s32.totalorder %v356_v26, %v1468_v47  ;;  %vm1734_vm12 = vmpackc.low %vm429_vm9, %vm427_vm4 }
  0xf8   : > { %v2078_v32 = vsel %vm1734_vm12, 4294967295, %v2077_v32  ;;  %vm1752_vm9 = vmpackc.low %vm428_vm11, %vm426_vm2 }
  0xf9   : > { %v353_v29 = vpop.permute.xlu1 %352  ;;  %v350_v30 = vpop.permute.xlu0 %349  ;;  %975 = vmatpush2.bf16.msk.msra.mxu0 %vm1728_vm14, %v1316_v54  ;;  %1039 = vmatpush2.bf16.msk.msra.mxu1 %vm1728_vm14, %v1316_v54  ;;  %v2080_v35 = vsel %vm1752_vm9, 4294967295, %v2079_v35 }
  0xfa   : > { %vm425_vm5 = vcmp.eq.s32.totalorder %v353_v29, %v1466_v46  ;;  %vm423_vm15 = vcmp.eq.s32.totalorder %v350_v30, %v1466_v46  ;;  %977 = vmatprep.subr.msk.bf16.mxu0 %vm1734_vm12, %v1316_v54  ;;  %1041 = vmatprep.subr.msk.bf16.mxu1 %vm1734_vm12, %v1316_v54  ;;  %vm424_vm4 = vcmp.eq.s32.totalorder %v353_v29, %v1468_v47 }
  0xfb   : > { %vm422_vm14 = vcmp.eq.s32.totalorder %v350_v30, %v1468_v47  ;;  %vm1758_vm1 = vmpackc.low %vm425_vm5, %vm423_vm15 }
  0xfc   : > { %v2082_v36 = vsel %vm1758_vm1, 4294967295, %v2081_v36  ;;  %vm1777_vm5 = vmpackc.low %vm424_vm4, %vm422_vm14 }
  0xfd   : > { %v347_v33 = vpop.permute.xlu1 %346  ;;  %v344_v34 = vpop.permute.xlu0 %343  ;;  %979 = vmatpush2.bf16.msk.msra.mxu0 %vm1752_vm9, %v1316_v54  ;;  %1043 = vmatpush2.bf16.msk.msra.mxu1 %vm1752_vm9, %v1316_v54  ;;  %v2084_v40 = vsel %vm1777_vm5, 4294967295, %v2083_v40 }
  0xfe   : > { %vm421_vm2 = vcmp.eq.s32.totalorder %v347_v33, %v1466_v46  ;;  %vm419_vm11 = vcmp.eq.s32.totalorder %v344_v34, %v1466_v46  ;;  %981 = vmatprep.subr.msk.bf16.mxu0 %vm1758_vm1, %v1316_v54  ;;  %1045 = vmatprep.subr.msk.bf16.mxu1 %vm1758_vm1, %v1316_v54  ;;  %vm420_vm15 = vcmp.eq.s32.totalorder %v347_v33, %v1468_v47 }
  0xff   : > { %vm418_vm9 = vcmp.eq.s32.totalorder %v344_v34, %v1468_v47  ;;  %vm1783_vm12 = vmpackc.low %vm421_vm2, %vm419_vm11 }
 0x100   : > { %v2086_v42 = vsel %vm1783_vm12, 4294967295, %v2085_v42  ;;  %vm1801_vm2 = vmpackc.low %vm420_vm15, %vm418_vm9 }
 0x101   : > { %v341_v38 = vpop.permute.xlu1 %340  ;;  %v338_v39 = vpop.permute.xlu0 %337  ;;  %983 = vmatpush2.bf16.msk.msra.mxu0 %vm1777_vm5, %v1316_v54  ;;  %1047 = vmatpush2.bf16.msk.msra.mxu1 %vm1777_vm5, %v1316_v54  ;;  %v2088_v45 = vsel %vm1801_vm2, 4294967295, %v2087_v45 }
 0x102   : > { %vm417_vm14 = vcmp.eq.s32.totalorder %v341_v38, %v1466_v46  ;;  %vm415_vm4 = vcmp.eq.s32.totalorder %v338_v39, %v1466_v46  ;;  %985 = vmatprep.subr.msk.bf16.mxu0 %vm1783_vm12, %v1316_v54  ;;  %1049 = vmatprep.subr.msk.bf16.mxu1 %vm1783_vm12, %v1316_v54  ;;  %vm416_vm11 = vcmp.eq.s32.totalorder %v341_v38, %v1468_v47 }
 0x103   : > { %vm414_vm5 = vcmp.eq.s32.totalorder %v338_v39, %v1468_v47  ;;  %vm1807_vm1 = vmpackc.low %vm417_vm14, %vm415_vm4 }
 0x104   : > { %vm1825_vm14 = vmpackc.low %vm416_vm11, %vm414_vm5  ;;  %vm2105_vm11 = vnez %v2064_v19 }
 0x105   : > { %v335_v43 = vpop.permute.xlu1 %334  ;;  %v332_v44 = vpop.permute.xlu0 %331  ;;  %987 = vmatpush2.bf16.msk.msra.mxu0 %vm1801_vm2, %v1316_v54  ;;  %1051 = vmatpush2.bf16.msk.msra.mxu1 %vm1801_vm2, %v1316_v54 }
 0x106   : > { %vm413_vm9 = vcmp.eq.s32.totalorder %v335_v43, %v1466_v46  ;;  %vm411_vm15 = vcmp.eq.s32.totalorder %v332_v44, %v1466_v46  ;;  %989 = vmatprep.subr.msk.bf16.mxu0 %vm1807_vm1, %v1316_v54  ;;  %1053 = vmatprep.subr.msk.bf16.mxu1 %vm1807_vm1, %v1316_v54  ;;  %vm412_vm4 = vcmp.eq.s32.totalorder %v335_v43, %v1468_v47 }
 0x107   : > { %vm410_vm2 = vcmp.eq.s32.totalorder %v332_v44, %v1468_v47  ;;  %vm1831_vm12 = vmpackc.low %vm413_vm9, %vm411_vm15  ;;  %v610_v47 = vpack.c.bf16 %v608_v53, %v608_v53  ;;  %vm2106_vm9 = vnez %v2066_v20  ;;  %vm2107_vm15 = vnez %v2068_v23 }
 0x108   : > { %vm1847_vm5 = vmpackc.low %vm412_vm4, %vm410_vm2  ;;  %vm2104_vm2 = vnez %v2062_v16  ;;  %vm2108_vm4 = vnez %v2070_v24 }
 0x109   : > { %991 = vmatpush2.bf16.msk.msra.mxu0 %vm1825_vm14, %v1316_v54  ;;  %1055 = vmatpush2.bf16.msk.msra.mxu1 %vm1825_vm14, %v1316_v54  ;;  %v612_v50 = vunpack.c.l.bf16 %v610_v47 }
 0x10a   : > { %993 = vmatprep.subr.msk.bf16.mxu0 %vm1831_vm12, %v1316_v54  ;;  %1057 = vmatprep.subr.msk.bf16.mxu1 %vm1831_vm12, %v1316_v54 }
 0x10b   : > { %v614_v51 = vsub.f32 %v608_v53, %v612_v50 }
 0x10d   : > { %995 = vmatpush2.bf16.msk.msra.mxu0 %vm1847_vm5, %v1316_v54  ;;  %1059 = vmatpush2.bf16.msk.msra.mxu1 %vm1847_vm5, %v1316_v54  ;;  %v616_v55 = vpack.c.bf16 %v614_v51, %v614_v51 }
 0x10e   : > { %1061 = vmatprep.subr.msk.bf16.mxu0 %vm1478_vm6, %v1316_v54  ;;  %vm2097_vm6 = vnez %v2048_v3 }
 0x110   : > { %651 = vmatmul.mubr.bf16.vlgmr.msra.gmra.mxu0 %v610_v47  ;;  %692 = vmatmul.mubr.bf16.vlgmr.msra.gmra.mxu1 %v604_v41 }
 0x111   : > { %1063 = vmatpush1.bf16.msk.msra.mxu0 %vm1488_vm7, %v1316_v54  ;;  %732 = vmatprep.mubr.bf16.mxu0 %v617_v58  ;;  %vm2098_vm7 = vnez %v2050_v4  ;;  %v743_v4 = vld [vmem:[%s1428_s18] sm:$0xff] }
 0x112   : > { %1065 = vmatprep.subr.msk.bf16.mxu0 %vm1494_vm10, %v1316_v54  ;;  %vm2099_vm10 = vnez %v2052_v7 }
 0x115   : > { %1067 = vmatpush1.bf16.msk.msra.mxu0 %vm1512_vm13, %v1316_v54  ;;  %vm2100_vm13 = vnez %v2054_v8  ;;  %v744_v8 = vld [vmem:[%s1428_s18 + $0x8] sm:$0xff] }
 0x116   : > { %1069 = vmatprep.subr.msk.bf16.mxu0 %vm1518_vm0, %v1316_v54  ;;  %vm2101_vm0 = vnez %v2056_v11 }
 0x119   : > { %1071 = vmatpush1.bf16.msk.msra.mxu0 %vm1536_vm3, %v1316_v54  ;;  %vm2102_vm3 = vnez %v2058_v12 }
 0x11a   : > { %1073 = vmatprep.subr.msk.bf16.mxu0 %vm1542_vm8, %v1316_v54  ;;  %vm2103_vm8 = vnez %v2060_v15 }
 0x11d   : > { %1075 = vmatpush1.bf16.msk.msra.mxu0 %vm2097_vm6, %v1316_v54  ;;  %vm2109_vm6 = vnez %v2072_v27 }
 0x11e   : > { %1077 = vmatprep.subr.msk.bf16.mxu0 %vm2098_vm7, %v1316_v54  ;;  %vm2110_vm7 = vnez %v2074_v28 }
 0x121   : > { %1079 = vmatpush1.bf16.msk.msra.mxu0 %vm2099_vm10, %v1316_v54  ;;  %vm2111_vm10 = vnez %v2076_v31 }
 0x122   : > { %1081 = vmatprep.subr.msk.bf16.mxu0 %vm2100_vm13, %v1316_v54  ;;  %vm2112_vm13 = vnez %v2078_v32 }
 0x125   : > { %1083 = vmatpush1.bf16.msk.msra.mxu0 %vm2101_vm0, %v1316_v54  ;;  %vm2113_vm0 = vnez %v2080_v35 }
 0x126   : > { %1085 = vmatprep.subr.msk.bf16.mxu0 %vm2102_vm3, %v1316_v54  ;;  %vm2114_vm3 = vnez %v2082_v36 }
 0x129   : > { %1087 = vmatpush1.bf16.msk.msra.mxu0 %vm2103_vm8, %v1316_v54  ;;  %vm2115_vm8 = vnez %v2084_v40 }
 0x12a   : > { %1089 = vmatprep.subr.msk.bf16.mxu0 %vm2104_vm2, %v1316_v54  ;;  %vm2116_vm2 = vnez %v2086_v42 }
 0x12d   : > { %1091 = vmatpush1.bf16.msk.msra.mxu0 %vm2105_vm11, %v1316_v54  ;;  %vm2117_vm11 = vnez %v2088_v45 }
 0x12e   : > { %1093 = vmatprep.subr.msk.bf16.mxu0 %vm2106_vm9, %v1316_v54 }
 0x131   : > { %1095 = vmatpush2.bf16.msk.msra.mxu0 %vm2107_vm15, %v1316_v54 }
 0x132   : > { %1097 = vmatprep.subr.msk.bf16.mxu0 %vm2108_vm4, %v1316_v54 }
 0x135   : > { %1099 = vmatpush2.bf16.msk.msra.mxu0 %vm2109_vm6, %v1316_v54 }
 0x136   : > { %1101 = vmatprep.subr.msk.bf16.mxu0 %vm2110_vm7, %v1316_v54 }
 0x139   : > { %1103 = vmatpush2.bf16.msk.msra.mxu0 %vm2111_vm10, %v1316_v54 }
 0x13a   : > { %1105 = vmatprep.subr.msk.bf16.mxu0 %vm2112_vm13, %v1316_v54 }
 0x13d   : > { %1107 = vmatpush2.bf16.msk.msra.mxu0 %vm2113_vm0, %v1316_v54 }
 0x13e   : > { %1109 = vmatprep.subr.msk.bf16.mxu0 %vm2114_vm3, %v1316_v54 }
 0x141   : > { %1111 = vmatpush2.bf16.msk.msra.mxu0 %vm2115_vm8, %v1316_v54 }
 0x142   : > { %1113 = vmatprep.subr.msk.bf16.mxu0 %vm2116_vm2, %v1316_v54 }
 0x145   : > { %1115 = vmatpush2.bf16.msk.msra.mxu0 %vm2117_vm11, %v1316_v54 }
 0x146   : > { %1117 = vmatprep.subr.msk.bf16.mxu0 %vm1807_vm1, %v1316_v54 }
 0x149   : > { %1119 = vmatpush2.bf16.msk.msra.mxu0 %vm1825_vm14, %v1316_v54 }
 0x14a   : > { %1121 = vmatprep.subr.msk.bf16.mxu0 %vm1831_vm12, %v1316_v54 }
 0x14d   : > { %1123 = vmatpush2.bf16.msk.msra.mxu0 %vm1847_vm5, %v1316_v54 }
 0x150   : > { %733 = vmatmul.mubr.bf16.vlgmr.msra.gmra.mxu0 %v616_v55 }
 0x1d0   : > { %v652_v56 = vpop.f32.mrf.mxu0  ;;  %v693_v59 = vpop.f32.mrf.mxu1 }
 0x1d1   : > { %v694_v2 = vadd.f32 %v693_v59, %v652_v56 }
 0x1d2   : > { %v654_v60 = vpop.f32.mrf.mxu0  ;;  %v695_v61 = vpop.f32.mrf.mxu1 }
 0x1d3   : > { %v696_v5 = vadd.f32 %v695_v61, %v654_v60 }
 0x1d4   : > { %v656_v62 = vpop.f32.mrf.mxu0  ;;  %v697_v63 = vpop.f32.mrf.mxu1 }
 0x1d6   : > { %v657_v0 = vpop.f32.mrf.mxu0  ;;  %v698_v1 = vpop.f32.mrf.mxu1 }
 0x210   : > { %v734_v3 = vpop.f32.mrf.mxu0 }
 0x211   : > { %v741_v6 = vadd.f32 %v734_v3, %v694_v2 }
 0x212   : > { %v736_v7 = vpop.f32.mrf.mxu0 }
 0x213   : > { %v745_v54 = vadd.f32 %v743_v4, %v741_v6  ;;  %v742_v9 = vadd.f32 %v736_v7, %v696_v5 }
 0x214   : > { %v738_v10 = vpop.f32.mrf.mxu0 }
 0x215   : > { %747 = vst [vmem:[%s1428_s18] sm:$0xff] %v745_v54  ;;  %v746_v11 = vadd.f32 %v744_v8, %v742_v9 }
 0x216   : > { %v739_v12 = vpop.f32.mrf.mxu0 }
 0x217   : > { %748 = vst [vmem:[%s1428_s18 + $0x8] sm:$0xff] %v746_v11 }
 0x218 PF: > { %s1130_s24 = scalar_select %p1395_p4, [#allocation3], [#allocation8] }
 0x219   : > { %s2130_s8 = smov (!%p1395_p4, %s1301_s8), 0  ;;  %s767_s26 = sshll.u32 %s1428_s18, 4  ;;  %s768_s26 = int_to_ptr.vmem [resolvable:$true] %s767_s26 }
 0x21a   : > { %s757_s25 = sld [smem:[%s1130_s24 + %s2130_s8]]  ;;  %s750_s29 = scalar_lea.sflag [#allocation7], %s204_s21 }
 0x21b   : > { %s1231_s30 = scalar_lea.vmem %s768_s26, 256  ;;  %s1317_s11 = smov [#allocation6]  }
 0x21c   : > { %p1232_p2 = scmp.ne.s32.totalorder %s768_s26, %s1231_s30  ;;  %s1235_s12 = sshll.u32 %s1317_s11, 4  ;;  %s1236_s12 = int_to_ptr.vmem [resolvable:$false] %s1235_s12 }
 0x21d   : > { %s1237_s14 = scalar_lea.vmem %s1236_s12, 512  ;;  %p1238_p6 = scmp.lt.s32.totalorder %s768_s26, %s1236_s12 }
 0x21e   : > { %p1233_p3 = pnand %p1232_p2, %p1395_p4  ;;  %p1239_p7 = scmp.lt.s32.totalorder %s1237_s14, %s1231_s30 }
 0x220   : > { %s1129_s0 = sshll.u32 %s757_s25, 8  ;;  %p1234_p5 = pneg %p1233_p3 }
 0x221   : > { %s765_s28 = scalar_lea.hbm %s2007_s5, %s1129_s0  ;;  %p1240_p8 = por %p1239_p7, %p1238_p6 }
 0x223   : > { %p1241_p10 = pnand %p1240_p8, %p1234_p5 }
 0x225   : > { %1244 = shalt.err (!%p1241_p10)
}
 0x226   : > { %s1245_s8 = scalar_lea.hbm %s765_s28, 256  ;;  %s1249_s18 = scalar_lea.hbm %s2007_s5, 256 }
 0x227   : > { %p1246_p11 = scmp.ne.s32.totalorder %s765_s28, %s1245_s8  ;;  %p1250_p0 = scmp.lt.s32.totalorder %s765_s28, %s2007_s5 }
 0x228   : > { %p1251_p1 = scmp.lt.s32.totalorder %s1249_s18, %s1245_s8 }
 0x229   : > { %p1247_p12 = pnand %p1246_p11, %p1395_p4 }
 0x22a   : > { %p1252_p2 = por %p1251_p1, %p1250_p0 }
 0x22b   : > { %p1248_p13 = pneg %p1247_p12 }
 0x22d   : > { %p1253_p3 = pnand %p1252_p2, %p1248_p13 }
 0x22f   : > { %1256 = shalt.err (!%p1253_p3)
}
 0x230   : > { %1132 = dma.vmem_to_hbm [thread:$0]  (%p1395_p4), %s768_s26, 256, %s765_s28, %s750_s29  }
 0x231 PF: > { %p1138_p5 = scmp.ge.s32.totalorder %s1309_s10, 2  ;;  %s779_s23 = sand.u32 1, %s1289_s6  }
 0x232   : > { %s780_s24 = scalar_lea.sflag [#allocation7], %s779_s23 }
 0x233   : > { %p1135_p6 = pnand %p1138_p5, %p1404_p9 }
 0x235   : > { %p1136_p7 = pneg %p1135_p6 }
 0x237   : > { %1284 = dma.done.wait (%p1136_p7), %s780_s24, 256  }
 0x238   : > { %1286 = vsyncadd (%p1136_p7), %s780_s24, 4294967040  ;;  %s32_s10 = sadd.s32 1, %s1309_s10   ;;  %s2118_s6 = smov %s1293_s7 }
 0x239   : > { %p29_p8 = scmp.ge.s32.totalorder %s32_s10, 11   ;;  %s2119_s7 = smov %s1297_s2 }
 0x23a   : > { %s2120_s2 = smov %s1410_s20  ;;  %s2121_s8 = smov %s1305_s9 }
 0x23b   : > { %s2122_s9 = smov %s2124_s13  ;;  %31 = sbr.rel (!%p29_p8) target bundleno = 39 (0x27), region = 74 }
 0x240   :  { %785 = vsyncpa [#allocation7], 1 }
 0x241   :  { %787 = vsyncpa [#allocation7 + $0x1], 1 }

</bundles_post_ra>
